<compile_context>
chip_gen: v6e
topology: v6e:2x2x1
jax: 0.10.0
libtpu: 0.0.40
codegen_flags: <defaults>
</compile_context>

<pallas_src>
import functools

import jax
import jax.numpy as jnp
from jax.experimental import pallas as pl
from jax.experimental.pallas import tpu as pltpu


def _round_up(x: int, m: int) -> int:
    return (x + m - 1) // m * m


# ---------------------------------------------------------------------------
# Fused GCN-stack + SumPooling kernel.  One grid step == one graph.
# ---------------------------------------------------------------------------
def _gcn_stack_kernel(alpha_ref,      # SMEM [L] f32  (scalar prefetch; PReLU slopes)
                      a_ref,          # VMEM [npg_p, npg_p] bf16  (this graph's adjacency block)
                      x_ref,          # VMEM [npg_p, in_p]  f32   (this graph's node features)
                      *rest,          # L weight refs (bf16), then h_ref, hg_ref
                      num_layers):
    w_refs = rest[:num_layers]
    h_ref, hg_ref = rest[num_layers], rest[num_layers + 1]

    a = a_ref[...]                    # bf16 adjacency block (stays in VMEM)
    h = x_ref[...]                    # f32 activations, resident across layers
    pooled = []
    for l in range(num_layers):
        # GraphConv(bias=False):  aggregate( X @ W )  — two MXU matmuls,
        # bf16 operands, f32 accumulation.
        xw = jnp.dot(h.astype(jnp.bfloat16), w_refs[l][...],
                     preferred_element_type=jnp.float32)
        ah = jnp.dot(a, xw.astype(jnp.bfloat16),
                     preferred_element_type=jnp.float32)
        # PReLU with a per-layer learnable slope, in f32 on the VPU.
        alpha = alpha_ref[l]
        h = jnp.where(ah > 0, ah, alpha * ah)
        # SumPooling: sublane reduction over this graph's (zero-padded) rows.
        pooled.append(jnp.sum(h, axis=0, keepdims=True))

    h_ref[...] = h.astype(h_ref.dtype)
    hg_ref[...] = jnp.concatenate(pooled, axis=0).astype(hg_ref.dtype)


# ---------------------------------------------------------------------------
# Wrapper: padding, BlockSpecs, grid over graphs.
# ---------------------------------------------------------------------------
def gcn_forward(adj_blocks, feat_blocks, weights, alphas):
    """Fused GCN forward.

    adj_blocks:  [G, npg, npg] f32 — per-graph dense adjacency diagonal blocks,
                 already normalized (norm='both') / edge-weighted (norm='none').
    feat_blocks: [G, npg, in_dim] f32 node features.
    weights:     list of L weight matrices ([in_dim,out_dim], then [out_dim,out_dim]).
    alphas:      [L] f32 PReLU slopes.
    Returns (h [G*npg, out_dim], hg [G, L*out_dim]) — same as GCN.forward.
    """
    G, npg, in_dim = feat_blocks.shape
    L = len(weights)
    out_dim = weights[0].shape[1]

    npg_p = _round_up(npg, 8)          # sublane alignment
    in_p = _round_up(in_dim, 128)      # lane-dense contraction dim
    out_p = _round_up(out_dim, 128)    # lane-dense output dim (unmasked vst)

    # Zero-padding keeps semantics exact: padded rows/cols stay exactly zero
    # through PReLU and contribute nothing to the pooled sums.
    adj_p = jnp.zeros((G, npg_p, npg_p), jnp.bfloat16)
    adj_p = adj_p.at[:, :npg, :npg].set(adj_blocks.astype(jnp.bfloat16))
    feat_p = jnp.zeros((G, npg_p, in_p), jnp.float32)
    feat_p = feat_p.at[:, :npg, :in_dim].set(feat_blocks)

    dims_p = [in_p] + [out_p] * L
    w_p = []
    for l, w in enumerate(weights):
        wp = jnp.zeros((dims_p[l], dims_p[l + 1]), jnp.bfloat16)
        wp = wp.at[:w.shape[0], :w.shape[1]].set(w.astype(jnp.bfloat16))
        w_p.append(wp)

    kernel = functools.partial(_gcn_stack_kernel, num_layers=L)

    grid_spec = pltpu.PrefetchScalarGridSpec(
        num_scalar_prefetch=1,                       # alphas -> SMEM
        grid=(G,),
        in_specs=[
            pl.BlockSpec((None, npg_p, npg_p), lambda g, *_: (g, 0, 0)),   # A[g]
            pl.BlockSpec((None, npg_p, in_p), lambda g, *_: (g, 0, 0)),    # X[g]
        ] + [pl.BlockSpec(w.shape, lambda g, *_: (0, 0)) for w in w_p],    # W_l (small, whole)
        out_specs=(
            pl.BlockSpec((None, npg_p, out_p), lambda g, *_: (g, 0, 0)),   # h[g]
            pl.BlockSpec((None, L, out_p), lambda g, *_: (g, 0, 0)),       # hg[g]
        ),
    )

    h_p, hg_p = pl.pallas_call(
        kernel,
        out_shape=(
            jax.ShapeDtypeStruct((G, npg_p, out_p), jnp.float32),
            jax.ShapeDtypeStruct((G, L, out_p), jnp.float32),
        ),
        grid_spec=grid_spec,
        compiler_params=pltpu.CompilerParams(
            dimension_semantics=("parallel",),       # shard graphs across TCs (v7x)
            vmem_limit_bytes=48 * 1024 * 1024,       # headroom under v7x's 64 MiB
        ),
    )(alphas, adj_p, feat_p, *w_p)

    h = h_p[:, :npg, :out_dim].reshape(G * npg, out_dim)
    hg = hg_p[:, :, :out_dim].reshape(G, L * out_dim)
    return h, hg


# ---------------------------------------------------------------------------
# Pure-JAX reference (same bf16 MXU casts as the kernel) for validation.
# ---------------------------------------------------------------------------
def gcn_reference(adj_blocks, feat_blocks, weights, alphas):
    a = adj_blocks.astype(jnp.bfloat16)
    h = feat_blocks
    pooled = []
    for l, w in enumerate(weights):
        xw = jnp.einsum("gnd,df->gnf", h.astype(jnp.bfloat16),
                        w.astype(jnp.bfloat16),
                        preferred_element_type=jnp.float32)
        ah = jnp.einsum("gnm,gmf->gnf", a, xw.astype(jnp.bfloat16),
                        preferred_element_type=jnp.float32)
        h = jnp.where(ah > 0, ah, alphas[l] * ah)
        pooled.append(jnp.sum(h, axis=1))
    G, npg, d = h.shape
    return h.reshape(G * npg, d), jnp.concatenate(pooled, axis=-1)


# ---------------------------------------------------------------------------
# Demo / self-test
# ---------------------------------------------------------------------------
if __name__ == "__main__":
    key = jax.random.PRNGKey(0)

    # Small shapes consistent with the module: 2 graphs x 64 nodes,
    # in_dim=16 -> out_dim=32, 2 GraphConv layers.
    G, NPG = 2, 64
    N = G * NPG
    IN_DIM, OUT_DIM, NUM_LAYERS = 16, 32, 2

    # Per-graph adjacency: ring + self loops, symmetrically normalized
    # (norm='both':  D^-1/2 A D^-1/2).
    idx = jnp.arange(NPG)
    ring = jnp.zeros((NPG, NPG), jnp.float32)
    ring = ring.at[idx, (idx + 1) % NPG].set(1.0)
    ring = ring.at[(idx + 1) % NPG, idx].set(1.0)
    adj = ring + jnp.eye(NPG, dtype=jnp.float32)
    deg = jnp.maximum(adj.sum(axis=1), 1.0)          # (fix: no deprecated clip(a_min=))
    d_is = deg ** -0.5
    adj_hat = d_is[:, None] * adj * d_is[None, :]
    adj_blocks = jnp.broadcast_to(adj_hat, (G, NPG, NPG)) + 0.0   # materialize

    # Node features and parameters (deterministic, synthetic).
    key, k_feat = jax.random.split(key)
    feat = jax.random.normal(k_feat, (N, IN_DIM), jnp.float32)
    feat_blocks = feat.reshape(G, NPG, IN_DIM)

    weights = []
    dims = [IN_DIM] + [OUT_DIM] * NUM_LAYERS
    for l in range(NUM_LAYERS):
        key, k = jax.random.split(key)
        weights.append(0.1 * jax.random.normal(k, (dims[l], dims[l + 1]),
                                               jnp.float32))
    alphas = jnp.full((NUM_LAYERS,), 0.25, jnp.float32)   # PReLU default init

    # Run the fused Pallas forward once.
    h, hg = jax.jit(gcn_forward)(adj_blocks, feat_blocks, weights, alphas)
    (h, hg) = jax.block_until_ready((h, hg))

    # Validate against the pure-JAX reference.
    h_ref, hg_ref = gcn_reference(adj_blocks, feat_blocks, weights, alphas)
    assert h.shape == (N, OUT_DIM), h.shape
    assert hg.shape == (G, NUM_LAYERS * OUT_DIM), hg.shape
    assert bool(jnp.all(jnp.isfinite(h))) and bool(jnp.all(jnp.isfinite(hg)))
    assert bool(jnp.allclose(h, h_ref, rtol=2e-2, atol=2e-2)), "h mismatch vs reference"
    assert bool(jnp.allclose(hg, hg_ref, rtol=2e-2, atol=2e-2)), "hg mismatch vs reference"

    print("KERNEL_OK")
</pallas_src>

<mosaic_0001>
module attributes {stable_mosaic.version = 11 : i64} {
  func.func @_gcn_stack_kernel(%arg0: i32, %arg1: memref<2xf32, #tpu.memory_space<smem>>, %arg2: memref<1x64x64xbf16, #tpu.memory_space<vmem>>, %arg3: memref<1x64x128xf32, #tpu.memory_space<vmem>>, %arg4: memref<128x128xbf16, #tpu.memory_space<vmem>>, %arg5: memref<128x128xbf16, #tpu.memory_space<vmem>>, %arg6: memref<1x64x128xf32, #tpu.memory_space<vmem>>, %arg7: memref<1x2x128xf32, #tpu.memory_space<vmem>>) attributes {dimension_semantics = [#tpu.dimension_semantics<parallel>], iteration_bounds = array<i64: 2>, scalar_prefetch = 1 : i64, scratch_operands = 0 : i64, tpu.core_type = #tpu.core_type<tc>, window_params = [{transform_indices = @transform_0, window_bounds = array<i64: 1, 64, 64>}, {transform_indices = @transform_1, window_bounds = array<i64: 1, 64, 128>}, {pipeline_mode = #tpu.pipeline_mode<synchronous>, transform_indices = @transform_2, window_bounds = array<i64: 128, 128>}, {pipeline_mode = #tpu.pipeline_mode<synchronous>, transform_indices = @transform_3, window_bounds = array<i64: 128, 128>}, {transform_indices = @transform_4, window_bounds = array<i64: 1, 64, 128>}, {transform_indices = @transform_5, window_bounds = array<i64: 1, 2, 128>}]} {
    %c0 = arith.constant 0 : index
    %c0_0 = arith.constant 0 : index
    %c0_1 = arith.constant 0 : index
    %0 = vector.load %arg2[%c0, %c0_0, %c0_1] : memref<1x64x64xbf16, #tpu.memory_space<vmem>>, vector<1x64x64xbf16>
    %1 = vector.shape_cast %0 : vector<1x64x64xbf16> to vector<64x64xbf16>
    %c0_2 = arith.constant 0 : index
    %c0_3 = arith.constant 0 : index
    %c0_4 = arith.constant 0 : index
    %2 = vector.load %arg3[%c0_2, %c0_3, %c0_4] : memref<1x64x128xf32, #tpu.memory_space<vmem>>, vector<1x64x128xf32>
    %3 = vector.shape_cast %2 : vector<1x64x128xf32> to vector<64x128xf32>
    %4 = arith.truncf %3 : vector<64x128xf32> to vector<64x128xbf16>
    %c0_5 = arith.constant 0 : index
    %c0_6 = arith.constant 0 : index
    %5 = vector.load %arg4[%c0_5, %c0_6] : memref<128x128xbf16, #tpu.memory_space<vmem>>, vector<128x128xbf16>
    %cst = arith.constant dense<0.000000e+00> : vector<64x128xf32>
    %6 = tpu.matmul %4, %5, %cst {dimension_numbers = #tpu.dot_dimension_numbers<[1], [0], [0], [1], [0, 0, 1, 1], [], []>} : vector<64x128xbf16>, vector<128x128xbf16>, vector<64x128xf32> -> vector<64x128xf32>
    %7 = arith.truncf %6 : vector<64x128xf32> to vector<64x128xbf16>
    %cst_7 = arith.constant dense<0.000000e+00> : vector<64x128xf32>
    %8 = tpu.matmul %1, %7, %cst_7 {dimension_numbers = #tpu.dot_dimension_numbers<[1], [0], [0], [1], [0, 0, 1, 1], [], []>} : vector<64x64xbf16>, vector<64x128xbf16>, vector<64x128xf32> -> vector<64x128xf32>
    %c0_8 = arith.constant 0 : index
    %9 = memref.load %arg1[%c0_8] : memref<2xf32, #tpu.memory_space<smem>>
    %cst_9 = arith.constant 0.000000e+00 : f32
    %10 = vector.broadcast %cst_9 : f32 to vector<64x128xf32>
    %11 = arith.cmpf ogt, %8, %10 : vector<64x128xf32>
    %12 = vector.broadcast %9 : f32 to vector<64x128xf32>
    %13 = arith.mulf %12, %8 : vector<64x128xf32>
    %14 = arith.select %11, %8, %13 : vector<64x128xi1>, vector<64x128xf32>
    %cst_10 = arith.constant dense<0.000000e+00> : vector<128xf32>
    %15 = vector.multi_reduction <add>, %14, %cst_10 [0] : vector<64x128xf32> to vector<128xf32>
    %16 = vector.shape_cast %15 : vector<128xf32> to vector<1x128xf32>
    %17 = arith.truncf %14 : vector<64x128xf32> to vector<64x128xbf16>
    %c0_11 = arith.constant 0 : index
    %c0_12 = arith.constant 0 : index
    %18 = vector.load %arg5[%c0_11, %c0_12] : memref<128x128xbf16, #tpu.memory_space<vmem>>, vector<128x128xbf16>
    %cst_13 = arith.constant dense<0.000000e+00> : vector<64x128xf32>
    %19 = tpu.matmul %17, %18, %cst_13 {dimension_numbers = #tpu.dot_dimension_numbers<[1], [0], [0], [1], [0, 0, 1, 1], [], []>} : vector<64x128xbf16>, vector<128x128xbf16>, vector<64x128xf32> -> vector<64x128xf32>
    %20 = arith.truncf %19 : vector<64x128xf32> to vector<64x128xbf16>
    %cst_14 = arith.constant dense<0.000000e+00> : vector<64x128xf32>
    %21 = tpu.matmul %1, %20, %cst_14 {dimension_numbers = #tpu.dot_dimension_numbers<[1], [0], [0], [1], [0, 0, 1, 1], [], []>} : vector<64x64xbf16>, vector<64x128xbf16>, vector<64x128xf32> -> vector<64x128xf32>
    %c1 = arith.constant 1 : index
    %22 = memref.load %arg1[%c1] : memref<2xf32, #tpu.memory_space<smem>>
    %cst_15 = arith.constant 0.000000e+00 : f32
    %23 = vector.broadcast %cst_15 : f32 to vector<64x128xf32>
    %24 = arith.cmpf ogt, %21, %23 : vector<64x128xf32>
    %25 = vector.broadcast %22 : f32 to vector<64x128xf32>
    %26 = arith.mulf %25, %21 : vector<64x128xf32>
    %27 = arith.select %24, %21, %26 : vector<64x128xi1>, vector<64x128xf32>
    %cst_16 = arith.constant dense<0.000000e+00> : vector<128xf32>
    %28 = vector.multi_reduction <add>, %27, %cst_16 [0] : vector<64x128xf32> to vector<128xf32>
    %29 = vector.shape_cast %28 : vector<128xf32> to vector<1x128xf32>
    %c0_17 = arith.constant 0 : index
    %c0_18 = arith.constant 0 : index
    %c0_19 = arith.constant 0 : index
    %30 = vector.load %arg6[%c0_17, %c0_18, %c0_19] : memref<1x64x128xf32, #tpu.memory_space<vmem>>, vector<1x64x128xf32>
    %31 = vector.shape_cast %30 : vector<1x64x128xf32> to vector<64x128xf32>
    %32 = vector.shape_cast %27 : vector<64x128xf32> to vector<1x64x128xf32>
    tpu.vector_store %arg6[%c0_17, %c0_18, %c0_19], %32 {strides = array<i32>} : memref<1x64x128xf32, #tpu.memory_space<vmem>>, vector<1x64x128xf32>,
    %33 = tpu.concatenate %16, %29 in 0 : vector<1x128xf32>, vector<1x128xf32> -> vector<2x128xf32>
    %c0_20 = arith.constant 0 : index
    %c0_21 = arith.constant 0 : index
    %c0_22 = arith.constant 0 : index
    %34 = vector.load %arg7[%c0_20, %c0_21, %c0_22] : memref<1x2x128xf32, #tpu.memory_space<vmem>>, vector<1x2x128xf32>
    %35 = vector.shape_cast %34 : vector<1x2x128xf32> to vector<2x128xf32>
    %36 = vector.shape_cast %33 : vector<2x128xf32> to vector<1x2x128xf32>
    tpu.vector_store %arg7[%c0_20, %c0_21, %c0_22], %36 {strides = array<i32>} : memref<1x2x128xf32, #tpu.memory_space<vmem>>, vector<1x2x128xf32>,
    return
  }
  func.func @transform_0(%arg0: i32, %arg1: memref<2xf32, #tpu.memory_space<smem>>) -> (i32, i32, i32) {
    %c0_i32 = arith.constant 0 : i32
    %c0_i32_0 = arith.constant 0 : i32
    %c0_i32_1 = arith.constant 0 : i32
    return %arg0, %c0_i32, %c0_i32_0 : i32, i32, i32
  }
  func.func @transform_1(%arg0: i32, %arg1: memref<2xf32, #tpu.memory_space<smem>>) -> (i32, i32, i32) {
    %c0_i32 = arith.constant 0 : i32
    %c0_i32_0 = arith.constant 0 : i32
    %c0_i32_1 = arith.constant 0 : i32
    return %arg0, %c0_i32, %c0_i32_0 : i32, i32, i32
  }
  func.func @transform_2(%arg0: i32, %arg1: memref<2xf32, #tpu.memory_space<smem>>) -> (i32, i32) {
    %c0_i32 = arith.constant 0 : i32
    %c0_i32_0 = arith.constant 0 : i32
    %c0_i32_1 = arith.constant 0 : i32
    return %c0_i32, %c0_i32_0 : i32, i32
  }
  func.func @transform_3(%arg0: i32, %arg1: memref<2xf32, #tpu.memory_space<smem>>) -> (i32, i32) {
    %c0_i32 = arith.constant 0 : i32
    %c0_i32_0 = arith.constant 0 : i32
    %c0_i32_1 = arith.constant 0 : i32
    return %c0_i32, %c0_i32_0 : i32, i32
  }
  func.func @transform_4(%arg0: i32, %arg1: memref<2xf32, #tpu.memory_space<smem>>) -> (i32, i32, i32) {
    %c0_i32 = arith.constant 0 : i32
    %c0_i32_0 = arith.constant 0 : i32
    %c0_i32_1 = arith.constant 0 : i32
    return %arg0, %c0_i32, %c0_i32_0 : i32, i32, i32
  }
  func.func @transform_5(%arg0: i32, %arg1: memref<2xf32, #tpu.memory_space<smem>>) -> (i32, i32, i32) {
    %c0_i32 = arith.constant 0 : i32
    %c0_i32_0 = arith.constant 0 : i32
    %c0_i32_1 = arith.constant 0 : i32
    return %arg0, %c0_i32, %c0_i32_0 : i32, i32, i32
  }
}

</mosaic_0001>

<bundles_post_ra>
// kernel: gcn_forward.1
= control target key start
LH: loop header
LB: loop body
LE: loop exit
PB: predicated region body
PF: predicated region fallthrough
CT: control target
= control target key end

     0   :  { %s1290_s0 = inlined_call_operand.vmem [shape: f32[2], index: 0, kind: input, shape index: {}]   ;;  %s1291_s1 = inlined_call_operand.vmem [shape: bf16[2,64,64], index: 1, kind: input, shape index: {}]   ;;  %s1292_s2 = inlined_call_operand.vmem [shape: f32[2,64,128], index: 2, kind: input, shape index: {}]   ;;  %s1293_s3 = inlined_call_operand.vmem [shape: bf16[128,128], index: 3, kind: input, shape index: {}]   ;;  %s1294_s4 = inlined_call_operand.vmem [shape: bf16[128,128], index: 4, kind: input, shape index: {}]   ;;  %s1295_s5 = inlined_call_operand.vmem [shape: f32[2,64,128], index: 5, kind: output, shape index: {0}]   ;;  %s1296_s6 = inlined_call_operand.vmem [shape: f32[2,2,128], index: 6, kind: output, shape index: {1}]  }
   0x1   :  { %s12_s23 = sshll.u32 %s1290_s0, 4  ;;  %s13_s23 = int_to_ptr.vmem [resolvable:$true] %s12_s23 }
   0x2   :  { %s1099_s24 = scalar_lea.vmem %s13_s23, 16  ;;  %p1104_p1 = scmp.lt.s32.totalorder %s13_s23, %s13_s23 }
   0x3   :  { %p1100_p0 = scmp.ne.s32.totalorder %s13_s23, %s1099_s24  ;;  %p1105_p2 = scmp.lt.s32.totalorder %s1099_s24, %s1099_s24 }
   0x5   :  { %p1106_p3 = por %p1105_p2, %p1104_p1 }
   0x7   :  { %p1107_p4 = pnand %p1106_p3, %p1100_p0 }
   0x9   :  { %1110 = shalt.err (!%p1107_p4)  }
   0xa   :  { %s1121_s25 = smov [#allocation3]  }
   0xb   :  { %15 = dma.vmem_to_smem %s13_s23, 16, %s1121_s25, [#allocation2] }
   0xc   :  { %1115 = dma.done.wait [#allocation2], 16 }
   0xd   :  { %1116 = vsyncadd [#allocation2], 4294967280 }
   0xe   :  { %17 = sfence }
   0xf   :  { %s1160_s26 = smov 0  }
  0x10 LB: > { %s904_s0 = sadd.s32 4294967295, %s1119_s26   ;;  %p908_p5 = scmp.ge.s32.totalorder %s1119_s26, 1  ;;  %s1119_s26 = sphi %s1160_s26, %s23_s26  }
  0x11   : > { %p207_p6 = scmp.lt.s32.totalorder %s1119_s26, 3 }
  0x13   : > { %p208_p7 = pnand %p908_p5, %p207_p6 }
  0x14   : > { %p244_p8 = scmp.lt.s32.totalorder (!%p208_p7), %s904_s0, 1  ;;  %s515_s21 = sld [smem:[#allocation3]] (!%p208_p7) }
  0x15   : > { %211 = sbr.rel (%p208_p7) target bundleno = 940 (0x3ac), region = 36  ;;  %s944_s22 = sld [smem:[#allocation3 + $0x1]] (!%p208_p7) }
  0x1a   : > { %v1079_v0 = vld [vmem:[%s1293_s3 + $0x38] sm:$0xff]   ;;  %v1080_v1 = vld [vmem:[%s1293_s3 + $0x30] sm:$0xff]   ;;  %s1298_s0 = smov (!%p244_p8, %s904_s0), 1  ;;  %v1081_v2 = vld [vmem:[%s1293_s3 + $0x28] sm:$0xff]   ;;  %vm437_vm0 = vcmask 523264   ;;  %v524_v46 = vstv %s515_s21 }
  0x1b   : > { %990 = vmatprep.subr.bf16.mxu0 %v1079_v0  ;;  %s948_s9 = sshll.u32 %s1298_s0, 6  ;;  %v1082_v3 = vld [vmem:[%s1293_s3 + $0x20] sm:$0xff]   ;;  %v1083_v7 = vld [vmem:[%s1293_s3 + $0x18] sm:$0xff]   ;;  %v1084_v8 = vld [vmem:[%s1293_s3 + $0x10] sm:$0xff]   ;;  %s947_s23 = sshll.u32 %s1298_s0, 5 }
  0x1c   : > { %991 = vmatpush3.bf16.msra.mxu0 %v1079_v0  ;;  %s1185_s12 = scalar_lea.vmem %s1292_s2, %s948_s9  ;;  %v1085_v9 = vld [vmem:[%s1293_s3 + $0x8] sm:$0xff]   ;;  %v1086_v10 = vld [vmem:[%s1293_s3] sm:$0xff]   ;;  %s1214_s27 = scalar_lea.vmem %s1291_s1, %s947_s23  ;;  %v1091_v33 = vld [vmem:[%s1294_s4 + $0x38] sm:$0xff]  }
  0x1d   : > { %992 = vmatprep.subr.bf16.mxu0 %v1080_v1  ;;  %v272_v4 = vld [vmem:[%s1185_s12] sm:$0xff]  ;;  %v273_v5 = vld [vmem:[%s1185_s12 + $0x8] sm:$0xff]  ;;  %v274_v11 = vld [vmem:[%s1185_s12 + $0x10] sm:$0xff]  ;;  %s1271_s25 = scalar_lea.vmem %s1295_s5, %s948_s9  ;;  %s915_s9 = sshll.u32 %s1298_s0, 1 }
  0x1e   : > { %v280_v6 = vpack.c.bf16 %v273_v5, %v272_v4  ;;  %v275_v12 = vld [vmem:[%s1185_s12 + $0x18] sm:$0xff]  ;;  %v276_v13 = vld [vmem:[%s1185_s12 + $0x20] sm:$0xff]  ;;  %v277_v14 = vld [vmem:[%s1185_s12 + $0x28] sm:$0xff]  ;;  %s262_s29 = scalar_lea.vmem %s1296_s6, %s915_s9 }
  0x1f   : > { %v281_v15 = vpack.c.bf16 %v275_v12, %v274_v11  ;;  %v282_v16 = vpack.c.bf16 %v277_v14, %v276_v13  ;;  %v278_v17 = vld [vmem:[%s1185_s12 + $0x30] sm:$0xff]  ;;  %v279_v18 = vld [vmem:[%s1185_s12 + $0x38] sm:$0xff]  ;;  %v1087_v20 = vld [vmem:[%s1214_s27] sm:$0xff]  }
  0x20   : > { %993 = vmatpush3.bf16.msra.mxu0 %v1080_v1  ;;  %1006 = vmatprep.mubr.bf16.mxu0 %v280_v6  ;;  %v283_v19 = vpack.c.bf16 %v279_v18, %v278_v17  ;;  %v1223_v34 = vld [vmem:[%s1214_s27 + $0x8] sm:$0xff]   ;;  %v1226_v35 = vld [vmem:[%s1214_s27 + $0x10] sm:$0xff]   ;;  %v1239_v38 = vld [vmem:[%s1214_s27 + $0x18] sm:$0xff]  }
  0x21   : > { %994 = vmatprep.subr.bf16.mxu0 %v1081_v2  ;;  %1022 = vmatprep.mubr.msk.bf16.mxu1 %vm437_vm0, %v1087_v20  ;;  %v1092_v36 = vld [vmem:[%s1294_s4 + $0x30] sm:$0xff]   ;;  %v1093_v37 = vld [vmem:[%s1294_s4 + $0x28] sm:$0xff]   ;;  %v1094_v39 = vld [vmem:[%s1294_s4 + $0x20] sm:$0xff]  }
  0x22   : > { %v1095_v40 = vld [vmem:[%s1294_s4 + $0x18] sm:$0xff]   ;;  %v1096_v41 = vld [vmem:[%s1294_s4 + $0x10] sm:$0xff]   ;;  %v1097_v42 = vld [vmem:[%s1294_s4 + $0x8] sm:$0xff]  }
  0x23   : > { %v1098_v43 = vld [vmem:[%s1294_s4] sm:$0xff]  }
  0x24   : > { %995 = vmatpush3.bf16.msra.mxu0 %v1081_v2 }
  0x25   : > { %996 = vmatprep.subr.bf16.mxu0 %v1082_v3 }
  0x28   : > { %997 = vmatpush3.bf16.msra.mxu0 %v1082_v3 }
  0x29   : > { %998 = vmatprep.subr.bf16.mxu0 %v1083_v7 }
  0x2c   : > { %999 = vmatpush3.bf16.msra.mxu0 %v1083_v7 }
  0x2d   : > { %1000 = vmatprep.subr.bf16.mxu0 %v1084_v8 }
  0x30   : > { %1001 = vmatpush3.bf16.msra.mxu0 %v1084_v8 }
  0x31   : > { %1002 = vmatprep.subr.bf16.mxu0 %v1085_v9 }
  0x34   : > { %1003 = vmatpush3.bf16.msra.mxu0 %v1085_v9 }
  0x35   : > { %1004 = vmatprep.subr.bf16.mxu0 %v1086_v10 }
  0x38   : > { %1005 = vmatpush3.bf16.msra.mxu0 %v1086_v10 }
  0x3b   : > { %1007 = vmatmul.mubr.bf16.vlgmr.msra.gmra.mxu0 %v281_v15 }
  0x3c   : > { %1010 = vmatprep.mubr.bf16.mxu0 %v282_v16 }
  0x43   : > { %1011 = vmatmul.mubr.bf16.gmra.mxu0 %v283_v19 }
  0x44   : > { %1062 = vmatprep.mubr.msk.bf16.mxu0 %vm437_vm0, %v1087_v20 }
  0xfb   : > { %v1008_v21 = vpop.f32.mrf.mxu0 }
  0xfd   : > { %v382_v22 = vpop.f32.mrf.mxu0 }
  0xff   : > { %v1009_v23 = vpop.f32.mrf.mxu0 }
 0x100   : > { %v414_v31 = vpack.c.bf16 %v1009_v23, %v1008_v21 }
 0x101   : > { %v385_v24 = vpop.f32.mrf.mxu0 }
 0x102   : > { %v413_v32 = vpack.c.bf16 %v385_v24, %v382_v22 }
 0x103   : > { %v1012_v25 = vpop.f32.mrf.mxu0 }
 0x105   : > { %v398_v26 = vpop.f32.mrf.mxu0 }
 0x107   : > { %v1013_v27 = vpop.f32.mrf.mxu0 }
 0x108   : > { %v416_v28 = vpack.c.bf16 %v1013_v27, %v1012_v25 }
 0x109   : > { %v401_v29 = vpop.f32.mrf.mxu0 }
 0x10a   : > { %v415_v30 = vpack.c.bf16 %v401_v29, %v398_v26  ;;  %1014 = vmatprep.subr.bf16.mxu1 %v416_v28 }
 0x10b   : > { %1015 = vmatpush3.bf16.msra.mxu1 %v416_v28  ;;  %v765_v28 = vstv %s944_s22 }
 0x10c   : > { %1016 = vmatprep.subr.bf16.mxu1 %v415_v30 }
 0x10f   : > { %1017 = vmatpush3.bf16.msra.mxu1 %v415_v30 }
 0x110   : > { %1018 = vmatprep.subr.bf16.mxu1 %v414_v31 }
 0x113   : > { %1019 = vmatpush3.bf16.msra.mxu1 %v414_v31 }
 0x114   : > { %1020 = vmatprep.subr.bf16.mxu1 %v413_v32 }
 0x117   : > { %1021 = vmatpush3.bf16.msra.mxu1 %v413_v32 }
 0x118   : > { %1030 = vmatprep.subr.bf16.mxu1 %v1091_v33 }
 0x11a   : > { %1023 = vmatmul.mubr.msk.bf16.vlgmr.msra.gmra.mxu1 %vm437_vm0, %v1223_v34 }
 0x11b   : > { %1026 = vmatprep.mubr.msk.bf16.mxu1 %vm437_vm0, %v1226_v35  ;;  %1031 = vmatpush3.bf16.msra.mxu1 %v1091_v33 }
 0x11c   : > { %1032 = vmatprep.subr.bf16.mxu1 %v1092_v36 }
 0x11f   : > { %1033 = vmatpush3.bf16.msra.mxu1 %v1092_v36 }
 0x120   : > { %1034 = vmatprep.subr.bf16.mxu1 %v1093_v37 }
 0x122   : > { %1027 = vmatmul.mubr.msk.bf16.gmra.mxu1 %vm437_vm0, %v1239_v38 }
 0x123   : > { %1035 = vmatpush3.bf16.msra.mxu1 %v1093_v37 }
 0x124   : > { %1036 = vmatprep.subr.bf16.mxu1 %v1094_v39 }
 0x127   : > { %1037 = vmatpush3.bf16.msra.mxu1 %v1094_v39 }
 0x128   : > { %1038 = vmatprep.subr.bf16.mxu1 %v1095_v40 }
 0x12b   : > { %1039 = vmatpush3.bf16.msra.mxu1 %v1095_v40 }
 0x12c   : > { %1040 = vmatprep.subr.bf16.mxu1 %v1096_v41 }
 0x12f   : > { %1041 = vmatpush3.bf16.msra.mxu1 %v1096_v41 }
 0x130   : > { %1042 = vmatprep.subr.bf16.mxu1 %v1097_v42 }
 0x133   : > { %1043 = vmatpush3.bf16.msra.mxu1 %v1097_v42 }
 0x134   : > { %1044 = vmatprep.subr.bf16.mxu1 %v1098_v43 }
 0x137   : > { %1045 = vmatpush3.bf16.msra.mxu1 %v1098_v43 }
 0x1da   : > { %v1024_v44 = vpop.f32.mrf.mxu1 }
 0x1db   : > { %v527_v50 = vmul.f32 %v1024_v44, %v524_v46  ;;  %vm518_vm3 = vcmp.gt.f32.partialorder %v1024_v44, 0.0 }
 0x1dc   : > { %v484_v45 = vpop.f32.mrf.mxu1 }
 0x1dd   : > { %v525_v48 = vmul.f32 %v524_v46, %v484_v45  ;;  %vm516_vm2 = vcmp.gt.f32.partialorder %v484_v45, 0.0  ;;  %v535_v57 = vsel %vm518_vm3, %v1024_v44, %v527_v50 }
 0x1de   : > { %v1025_v47 = vpop.f32.mrf.mxu1 }
 0x1df   : > { %vm519_vm1 = vcmp.gt.f32.partialorder %v1025_v47, 0.0  ;;  %v528_v49 = vmul.f32 %v1025_v47, %v524_v46  ;;  %v533_v55 = vsel %vm516_vm2, %v484_v45, %v525_v48 }
 0x1e0   : > { %v487_v51 = vpop.f32.mrf.mxu1 }
 0x1e1   : > { %vm517_vm4 = vcmp.gt.f32.partialorder %v487_v51, 0.0  ;;  %v526_v52 = vmul.f32 %v524_v46, %v487_v51  ;;  %v536_v53 = vsel %vm519_vm1, %v1025_v47, %v528_v49  ;;  %vm803_vm1 = vcmask 1040384  }
 0x1e2   : > { %v1028_v54 = vpop.f32.mrf.mxu1  ;;  %v555_v61 = vpack.c.bf16 %v536_v53, %v535_v57 }
 0x1e3   : > { %v534_v56 = vsel %vm517_vm4, %v487_v51, %v526_v52  ;;  %v531_v2 = vmul.f32 %v1028_v54, %v524_v46  ;;  %vm522_vm7 = vcmp.gt.f32.partialorder %v1028_v54, 0.0 }
 0x1e4   : > { %v541_v58 = vadd.f32 %v534_v56, %v533_v55  ;;  %v500_v59 = vpop.f32.mrf.mxu1  ;;  %v554_v60 = vpack.c.bf16 %v534_v56, %v533_v55 }
 0x1e5   : > { %v529_v62 = vmul.f32 %v524_v46, %v500_v59  ;;  %vm520_vm5 = vcmp.gt.f32.partialorder %v500_v59, 0.0  ;;  %v539_v10 = vsel %vm522_vm7, %v1028_v54, %v531_v2 }
 0x1e6   : > { %v542_v63 = vadd.f32 %v541_v58, %v535_v57  ;;  %v1029_v0 = vpop.f32.mrf.mxu1  ;;  %1046 = vmatprep.mubr.bf16.mxu1 %v554_v60 }
 0x1e7   : > { %vm523_vm6 = vcmp.gt.f32.partialorder %v1029_v0, 0.0  ;;  %v532_v1 = vmul.f32 %v1029_v0, %v524_v46  ;;  %1047 = vmatmul.mubr.bf16.vlgmr.msra.gmra.mxu1 %v555_v61  ;;  %v537_v5 = vsel %vm520_vm5, %v500_v59, %v529_v62 }
 0x1e8   : > { %v543_v3 = vadd.f32 %v542_v63, %v536_v53  ;;  %v503_v4 = vpop.f32.mrf.mxu1 }
 0x1e9   : > { %vm521_vm8 = vcmp.gt.f32.partialorder %v503_v4, 0.0  ;;  %v530_v6 = vmul.f32 %v524_v46, %v503_v4  ;;  %v540_v8 = vsel %vm523_vm6, %v1029_v0, %v532_v1 }
 0x1ea   : > { %v544_v7 = vadd.f32 %v543_v3, %v537_v5  ;;  %v557_v13 = vpack.c.bf16 %v540_v8, %v539_v10 }
 0x1eb   : > { %v538_v9 = vsel %vm521_vm8, %v503_v4, %v530_v6 }
 0x1ec   : > { %v545_v11 = vadd.f32 %v544_v7, %v538_v9  ;;  %v556_v12 = vpack.c.bf16 %v538_v9, %v537_v5 }
 0x1ee   : > { %v546_v14 = vadd.f32 %v545_v11, %v539_v10  ;;  %1050 = vmatprep.mubr.bf16.mxu1 %v556_v12 }
 0x1ef   : > { %1051 = vmatmul.mubr.bf16.gmra.mxu1 %v557_v13 }
 0x1f0   : > { %v1258_v15 = vadd.f32 %v546_v14, %v540_v8 }
 0x1f2   : > { %v548_v51 = vrot.slane %v1258_v15, 4 }
 0x1f4   : > { %v549_v58 = vadd.f32 %v548_v51, %v1258_v15 }
 0x1f6   : > { %v550_v61 = vrot.slane %v549_v58, 2 }
 0x1f8   : > { %v551_v0 = vadd.f32 %v550_v61, %v549_v58 }
 0x1fa   : > { %v552_v3 = vrot.slane %v551_v0, 1 }
 0x1fc   : > { %v553_v6 = vadd.f32 %v552_v3, %v551_v0 }
 0x2a7   : > { %v1048_v16 = vpop.f32.mrf.mxu1 }
 0x2a9   : > { %v656_v17 = vpop.f32.mrf.mxu1 }
 0x2ab   : > { %v1049_v18 = vpop.f32.mrf.mxu1 }
 0x2ac   : > { %v688_v26 = vpack.c.bf16 %v1049_v18, %v1048_v16 }
 0x2ad   : > { %v659_v19 = vpop.f32.mrf.mxu1 }
 0x2ae   : > { %v687_v27 = vpack.c.bf16 %v659_v19, %v656_v17 }
 0x2af   : > { %v1052_v20 = vpop.f32.mrf.mxu1 }
 0x2b1   : > { %v672_v21 = vpop.f32.mrf.mxu1 }
 0x2b3   : > { %v1053_v22 = vpop.f32.mrf.mxu1 }
 0x2b4   : > { %v690_v23 = vpack.c.bf16 %v1053_v22, %v1052_v20 }
 0x2b5   : > { %v675_v24 = vpop.f32.mrf.mxu1 }
 0x2b6   : > { %v689_v25 = vpack.c.bf16 %v675_v24, %v672_v21  ;;  %1054 = vmatprep.subr.bf16.mxu0 %v690_v23 }
 0x2b7   : > { %1055 = vmatpush3.bf16.msra.mxu0 %v690_v23 }
 0x2b8   : > { %1056 = vmatprep.subr.bf16.mxu0 %v689_v25 }
 0x2bb   : > { %1057 = vmatpush3.bf16.msra.mxu0 %v689_v25 }
 0x2bc   : > { %1058 = vmatprep.subr.bf16.mxu0 %v688_v26 }
 0x2bf   : > { %1059 = vmatpush3.bf16.msra.mxu0 %v688_v26 }
 0x2c0   : > { %1060 = vmatprep.subr.bf16.mxu0 %v687_v27 }
 0x2c3   : > { %1061 = vmatpush3.bf16.msra.mxu0 %v687_v27 }
 0x2c6   : > { %1063 = vmatmul.mubr.msk.bf16.vlgmr.msra.gmra.mxu0 %vm437_vm0, %v1223_v34 }
 0x2c7   : > { %1066 = vmatprep.mubr.msk.bf16.mxu0 %vm437_vm0, %v1226_v35 }
 0x2ce   : > { %1067 = vmatmul.mubr.msk.bf16.gmra.mxu0 %vm437_vm0, %v1239_v38 }
 0x386   : > { %v1064_v29 = vpop.f32.mrf.mxu0 }
 0x387   : > { %vm759_vm9 = vcmp.gt.f32.partialorder %v1064_v29, 0.0  ;;  %v768_v30 = vmul.f32 %v1064_v29, %v765_v28 }
 0x388   : > { %v725_v31 = vpop.f32.mrf.mxu0 }
 0x389   : > { %v776_v32 = vsel %vm759_vm9, %v1064_v29, %v768_v30  ;;  %vm757_vm10 = vcmp.gt.f32.partialorder %v725_v31, 0.0  ;;  %v766_v33 = vmul.f32 %v765_v28, %v725_v31 }
 0x38a   : > { %797 = vst [vmem:[%s1271_s25 + $0x10] sm:$0xff] %v776_v32  ;;  %v1065_v34 = vpop.f32.mrf.mxu0 }
 0x38b   : > { %v774_v35 = vsel %vm757_vm10, %v725_v31, %v766_v33  ;;  %vm760_vm11 = vcmp.gt.f32.partialorder %v1065_v34, 0.0  ;;  %v769_v36 = vmul.f32 %v1065_v34, %v765_v28 }
 0x38c   : > { %795 = vst [vmem:[%s1271_s25] sm:$0xff] %v774_v35  ;;  %v728_v37 = vpop.f32.mrf.mxu0 }
 0x38d   : > { %v777_v38 = vsel %vm760_vm11, %v1065_v34, %v769_v36  ;;  %vm758_vm12 = vcmp.gt.f32.partialorder %v728_v37, 0.0  ;;  %v767_v39 = vmul.f32 %v765_v28, %v728_v37 }
 0x38e   : > { %798 = vst [vmem:[%s1271_s25 + $0x18] sm:$0xff] %v777_v38  ;;  %v1068_v40 = vpop.f32.mrf.mxu0 }
 0x38f   : > { %v775_v41 = vsel %vm758_vm12, %v728_v37, %v767_v39  ;;  %vm763_vm13 = vcmp.gt.f32.partialorder %v1068_v40, 0.0  ;;  %v772_v42 = vmul.f32 %v1068_v40, %v765_v28 }
 0x390   : > { %v782_v43 = vadd.f32 %v775_v41, %v774_v35  ;;  %796 = vst [vmem:[%s1271_s25 + $0x8] sm:$0xff] %v775_v41  ;;  %v741_v44 = vpop.f32.mrf.mxu0 }
 0x391   : > { %v780_v45 = vsel %vm763_vm13, %v1068_v40, %v772_v42  ;;  %vm761_vm14 = vcmp.gt.f32.partialorder %v741_v44, 0.0  ;;  %v770_v46 = vmul.f32 %v765_v28, %v741_v44 }
 0x392   : > { %v783_v47 = vadd.f32 %v782_v43, %v776_v32  ;;  %801 = vst [vmem:[%s1271_s25 + $0x30] sm:$0xff] %v780_v45  ;;  %v1069_v48 = vpop.f32.mrf.mxu0 }
 0x393   : > { %v778_v49 = vsel %vm761_vm14, %v741_v44, %v770_v46  ;;  %vm764_vm15 = vcmp.gt.f32.partialorder %v1069_v48, 0.0  ;;  %v773_v50 = vmul.f32 %v1069_v48, %v765_v28 }
 0x394   : > { %v784_v52 = vadd.f32 %v783_v47, %v777_v38  ;;  %799 = vst [vmem:[%s1271_s25 + $0x20] sm:$0xff] %v778_v49  ;;  %v744_v53 = vpop.f32.mrf.mxu0 }
 0x395   : > { %v781_v54 = vsel %vm764_vm15, %v1069_v48, %v773_v50  ;;  %vm762_vm0 = vcmp.gt.f32.partialorder %v744_v53, 0.0  ;;  %v771_v55 = vmul.f32 %v765_v28, %v744_v53 }
 0x396   : > { %v785_v56 = vadd.f32 %v784_v52, %v778_v49  ;;  %802 = vst [vmem:[%s1271_s25 + $0x38] sm:$0xff] %v781_v54 }
 0x397   : > { %v779_v57 = vsel %vm762_vm0, %v744_v53, %v771_v55 }
 0x398   : > { %v786_v59 = vadd.f32 %v785_v56, %v779_v57  ;;  %800 = vst [vmem:[%s1271_s25 + $0x28] sm:$0xff] %v779_v57 }
 0x39a   : > { %v787_v60 = vadd.f32 %v786_v59, %v780_v45 }
 0x39c   : > { %v788_v62 = vadd.f32 %v787_v60, %v781_v54 }
 0x39e   : > { %v789_v63 = vrot.slane %v788_v62, 4 }
 0x3a0   : > { %v790_v1 = vadd.f32 %v789_v63, %v788_v62 }
 0x3a2   : > { %v791_v2 = vrot.slane %v790_v1, 2 }
 0x3a4   : > { %v792_v4 = vadd.f32 %v791_v2, %v790_v1 }
 0x3a6   : > { %v793_v5 = vrot.slane %v792_v4, 1 }
 0x3a8   : > { %v794_v7 = vadd.f32 %v793_v5, %v792_v4 }
 0x3aa   : > { %v804_v8 = vsel %vm803_vm1, %v553_v6, %v794_v7 }
 0x3ab   : > { %805 = vst [vmem:[%s262_s29] sm:$0x3] %v804_v8 }
 0x3ac PF: > { %s23_s26 = sadd.s32 1, %s1119_s26  }
 0x3ad   : > { %p20_p9 = scmp.ge.s32.totalorder %s23_s26, 4  }
 0x3af   :  { %22 = sbr.rel (!%p20_p9) target bundleno = 16 (0x10), region = 81 }

</bundles_post_ra>
